<compile_context>
chip_gen: v6e
topology: v6e:2x2x1
jax: 0.10.0
libtpu: 0.0.40
codegen_flags: <defaults>
</compile_context>

<pallas_src>
import functools
import math

import numpy as np
import jax
import jax.numpy as jnp
from jax import lax
from jax.experimental import pallas as pl
from jax.experimental.pallas import tpu as pltpu

_HALF_LOG_2PI = 0.9189385332046727  # 0.5 * log(2*pi)


def _fit_binet_coeffs(degree=12, samples=512):
    """Fit g(x), x = 2/z - 1 in [-1, 1], where g = z * mu(z) and
    mu(z) = lgamma(z) - ((z-0.5)*log z - z + 0.5*log 2pi) is the Binet function,
    over z in [1, inf).  Least-squares on Chebyshev nodes, float64, done once at
    import time; the resulting in-kernel gammaln is accurate to ~1e-6 absolute
    for all z >= 1 and is asymptotically exact for large z (no f32 overflow)."""

    def g_of_u(u):  # u = 1/z in (0, 1]
        if u < 0.125:
            # Asymptotic (Binet) series; truncation error < 1e-11 for u <= 1/8.
            u2 = u * u
            return 1.0 / 12.0 + u2 * (-1.0 / 360.0 + u2 * (
                1.0 / 1260.0 + u2 * (-1.0 / 1680.0 + u2 * (1.0 / 1188.0))))
        z = 1.0 / u
        mu = math.lgamma(z) - ((z - 0.5) * math.log(z) - z
                               + 0.5 * math.log(2.0 * math.pi))
        return mu * z

    k = np.arange(samples, dtype=np.float64)
    u = 0.5 - 0.5 * np.cos(np.pi * (k + 0.5) / samples)  # Chebyshev nodes in (0, 1)
    u = np.concatenate([u, [1.0]])
    g = np.array([g_of_u(float(v)) for v in u])
    x = 2.0 * u - 1.0                                     # well-conditioned basis
    vander = np.vander(x, degree + 1, increasing=True)
    coef, *_ = np.linalg.lstsq(vander, g, rcond=None)
    return tuple(float(c) for c in coef)                  # low -> high degree


_BINET_COEF = _fit_binet_coeffs()


def _horner(x, coeffs_low_to_high):
    acc = jnp.full_like(x, coeffs_low_to_high[-1])
    for c in coeffs_low_to_high[-2::-1]:
        acc = acc * x + c
    return acc


def _gammaln1p(targ):
    """log Gamma(1 + targ) for targ >= 0 (z = 1 + targ >= 1).

    Stirling/Binet form: 1 log + 1 approx reciprocal on the EUP per element;
    the correction polynomial is pure VPU (Horner) and the Newton step for the
    reciprocal is VPU.  Valid Poisson targets give z >= 1; targ < 0 is outside
    the fitted domain (and outside sensible inputs for this loss).
    """
    z = 1.0 + targ
    u = pl.reciprocal(z, approx=True)
    u = u * (2.0 - z * u)              # one Newton step (VPU) -> ~full f32 accuracy
    g = _horner(2.0 * u - 1.0, _BINET_COEF)
    return (z - 0.5) * jnp.log(z) - z + _HALF_LOG_2PI + u * g


def _poisson_nll_partial_kernel(pred_ref, targ_ref, out_ref, *, rows,
                                block_rows, blocks_per_split, masked):
    """Accumulates per-lane partial sums of
         xlogy(targ, pred+1e-8) - (pred+1e-8) - gammaln(1+targ)
    into a resident (8, cols) output block (one block per split)."""
    c = pl.program_id(0)   # split axis (CORE_PARALLEL on multi-TensorCore chips)
    i = pl.program_id(1)   # arbitrary (reduction) axis over row blocks

    @pl.when(i == 0)
    def _():
        out_ref[...] = jnp.zeros_like(out_ref)

    pred = pred_ref[...].astype(jnp.float32)
    targ = targ_ref[...].astype(jnp.float32)

    pred_ = pred + 1e-8
    # xlogy semantics: exactly 0 where targ == 0, regardless of log(pred_).
    xlogy = jnp.where(targ == 0.0, 0.0, targ * jnp.log(pred_))
    term = xlogy - pred_ - _gammaln1p(targ)

    cols = term.shape[-1]

    def _fold(t):
        # (block_rows, cols) -> (8, cols): tile-aligned reshape, pure VPU adds.
        return t.reshape(block_rows // 8, 8, cols).sum(axis=0)

    if masked:  # static: only emitted when rows don't tile exactly
        # Only boundary / past-the-end blocks pay for the row mask.
        row_start = (c * blocks_per_split + i) * block_rows
        interior = row_start + block_rows <= rows

        @pl.when(interior)
        def _():
            out_ref[...] += _fold(term)

        @pl.when(jnp.logical_not(interior))
        def _():
            rid = row_start + lax.broadcasted_iota(jnp.int32, term.shape, 0)
            out_ref[...] += _fold(jnp.where(rid < rows, term, 0.0))
    else:
        out_ref[...] += _fold(term)


def _default_num_splits():
    """2 on v7x-class chips (two TensorCores per chip), else 1 (v5e/v6e)."""
    try:
        kind = jax.local_devices()[0].device_kind.lower()
    except Exception:
        return 1
    return 2 if ("v7" in kind or "tpu7" in kind) else 1


def _lane_dense_view(pred, targ, max_cols=8192):
    """Row-major, sum-preserving reshape to a lane-dense (cols % 128 == 0) and
    VMEM-friendly (cols <= max_cols) 2-D view when possible.  Pure layout
    plumbing: the loss is a full sum, so any row-major reshape is free
    semantically."""
    rows, cols = pred.shape
    if cols % 128 == 0 and cols <= max_cols:
        return pred, targ
    total = rows * cols
    for cand in (4096, 2048, 1024, 512, 256, 128):
        if total % cand == 0:
            return (pred.reshape(total // cand, cand),
                    targ.reshape(total // cand, cand))
    return pred, targ  # no clean factorization; keep the original view


def poisson_loss(pred, targ, *, n_splits=None,
                 vmem_block_budget=16 * 1024 * 1024,
                 vmem_limit_bytes=32 * 1024 * 1024):
    """Pallas equivalent of the torch `Loss` module's forward."""
    assert pred.shape == targ.shape and pred.ndim == 2
    orig_rows = pred.shape[0]          # normalization uses the caller's shape

    pred, targ = _lane_dense_view(pred, targ)
    rows, cols = pred.shape

    if n_splits is None:
        n_splits = _default_num_splits()

    # Tile sizing: per block row we hold 2 inputs x 2 pipeline buffers plus
    # ~4 live f32 intermediates in the body.  Largest multiple-of-8 row count
    # that fits the budget; no artificial max_block_rows cap.
    itemsize = max(pred.dtype.itemsize, targ.dtype.itemsize)
    bytes_per_row = cols * (2 * 2 * itemsize + 4 * 4)
    vmem_rows = max(8, (vmem_block_budget // bytes_per_row) // 8 * 8)

    rows_per_split8 = max(8, ((pl.cdiv(rows, n_splits) + 7) // 8) * 8)
    block_rows = int(min(vmem_rows, rows_per_split8))

    nblocks = pl.cdiv(rows, block_rows)
    n_splits = max(1, min(n_splits, nblocks))
    blocks_per_split = pl.cdiv(nblocks, n_splits)
    masked = (n_splits * blocks_per_split * block_rows) != rows

    if n_splits * blocks_per_split == nblocks:
        def in_map(c, i):
            return (c * blocks_per_split + i, 0)
    else:
        # Split axis overshoots the real block count: clamp the DMA to the
        # last block (its contribution is zeroed by the in-kernel row mask).
        def in_map(c, i):
            return (jnp.minimum(c * blocks_per_split + i, nblocks - 1), 0)

    kernel = functools.partial(
        _poisson_nll_partial_kernel, rows=rows, block_rows=block_rows,
        blocks_per_split=blocks_per_split, masked=masked)

    n_elems = rows * cols
    cost = pl.CostEstimate(
        flops=45 * n_elems,              # Horner(12) + Newton + elementwise glue
        transcendentals=3 * n_elems,     # 2 logs + 1 approx reciprocal / element
        bytes_accessed=2 * n_elems * itemsize + n_splits * 8 * cols * 4,
    )

    if n_splits > 1:
        # Only CORE_PARALLEL reliably splits grid steps across TensorCores.
        dims = (getattr(pltpu, "CORE_PARALLEL", "parallel"),
                getattr(pltpu, "ARBITRARY", "arbitrary"))
    else:
        dims = ("arbitrary", "arbitrary")

    partials = pl.pallas_call(
        kernel,
        out_shape=jax.ShapeDtypeStruct((n_splits * 8, cols), jnp.float32),
        grid_spec=pltpu.PrefetchScalarGridSpec(
            num_scalar_prefetch=0,
            grid=(n_splits, blocks_per_split),
            in_specs=[
                pl.BlockSpec((block_rows, cols), in_map),
                pl.BlockSpec((block_rows, cols), in_map),
            ],
            out_specs=pl.BlockSpec((8, cols), lambda c, i: (c, 0)),
        ),
        compiler_params=pltpu.CompilerParams(
            dimension_semantics=dims,
            vmem_limit_bytes=vmem_limit_bytes),
        cost_estimate=cost,
    )(pred, targ)

    # Glue: tiny final cross-lane reduce, negation, normalize by pred.shape[0].
    return -jnp.sum(partials) / orig_rows


def poisson_loss_ref(pred, targ):
    """Pure-JAX reference (mirrors the torch forward exactly)."""
    pred_ = pred + 1e-8
    terms = (
        jax.scipy.special.xlogy(targ, pred_)
        - pred_
        - jax.scipy.special.gammaln(1.0 + targ)
    )
    return -jnp.sum(terms) / pred.shape[0]


def _check(name, pred, targ, **kw):
    loss = jax.block_until_ready(poisson_loss(pred, targ, **kw))
    ref = jax.block_until_ready(poisson_loss_ref(pred, targ))
    assert jnp.isfinite(loss), f"{name}: kernel produced non-finite loss"
    assert jnp.allclose(loss, ref, rtol=1e-3, atol=1e-3), (
        f"{name}: mismatch pallas={loss} ref={ref}")


if __name__ == "__main__":
    key = jax.random.PRNGKey(0)
    ks = jax.random.split(key, 6)

    # Case 1: tile-friendly shape (single block, unmasked fast path).
    pred = jax.random.uniform(ks[0], (16, 128), jnp.float32, 0.05, 5.0)
    targ = jnp.floor(jax.random.uniform(ks[1], (16, 128), jnp.float32, 0.0, 6.0))
    _check("case1", pred, targ)

    # Case 2: rows not divisible by the sublane tile -> boundary-block row mask.
    pred2 = jax.random.uniform(ks[2], (13, 256), jnp.float32, 0.05, 5.0)
    targ2 = jnp.floor(jax.random.uniform(ks[3], (13, 256), jnp.float32, 0.0, 6.0))
    _check("case2", pred2, targ2)

    # Case 3: multi-block reduction (small VMEM budget forces several grid
    # steps) + large counts exercising the Stirling/Binet gammaln.
    pred3 = jax.random.uniform(ks[4], (1000, 128), jnp.float32, 0.05, 300.0)
    targ3 = jnp.floor(jax.random.uniform(ks[5], (1000, 128), jnp.float32, 0.0, 300.0))
    _check("case3", pred3, targ3, vmem_block_budget=256 * 1024)

    print("KERNEL_OK")
</pallas_src>

<mosaic_0001>
module attributes {stable_mosaic.version = 11 : i64} {
  func.func @_poisson_nll_partial_kernel(%arg0: i32, %arg1: i32, %arg2: memref<16x128xf32, #tpu.memory_space<vmem>>, %arg3: memref<16x128xf32, #tpu.memory_space<vmem>>, %arg4: memref<8x128xf32, #tpu.memory_space<vmem>>) attributes {dimension_semantics = [#tpu.dimension_semantics<arbitrary>, #tpu.dimension_semantics<arbitrary>], iteration_bounds = array<i64: 1, 1>, scalar_prefetch = 0 : i64, scratch_operands = 0 : i64, tpu.core_type = #tpu.core_type<tc>, window_params = [{transform_indices = @transform_0, window_bounds = array<i64: 16, 128>}, {transform_indices = @transform_1, window_bounds = array<i64: 16, 128>}, {transform_indices = @transform_2, window_bounds = array<i64: 8, 128>}]} {
    %c0_i32 = arith.constant 0 : i32
    %0 = arith.cmpi eq, %arg1, %c0_i32 : i32
    %1 = arith.extui %0 : i1 to i32
    %c0_i32_0 = arith.constant 0 : i32
    %2 = arith.cmpi ne, %1, %c0_i32_0 : i32
    scf.if %2 {
      %cst_30 = arith.constant 0.000000e+00 : f32
      %77 = vector.broadcast %cst_30 : f32 to vector<8x128xf32>
      %c0_31 = arith.constant 0 : index
      %c0_32 = arith.constant 0 : index
      %78 = vector.load %arg4[%c0_31, %c0_32] : memref<8x128xf32, #tpu.memory_space<vmem>>, vector<8x128xf32>
      tpu.vector_store %arg4[%c0_31, %c0_32], %77 {strides = array<i32>} : memref<8x128xf32, #tpu.memory_space<vmem>>, vector<8x128xf32>,
    } else {
    }
    %c0 = arith.constant 0 : index
    %c0_1 = arith.constant 0 : index
    %3 = vector.load %arg2[%c0, %c0_1] : memref<16x128xf32, #tpu.memory_space<vmem>>, vector<16x128xf32>
    %c0_2 = arith.constant 0 : index
    %c0_3 = arith.constant 0 : index
    %4 = vector.load %arg3[%c0_2, %c0_3] : memref<16x128xf32, #tpu.memory_space<vmem>>, vector<16x128xf32>
    %cst = arith.constant 9.99999993E-9 : f32
    %5 = vector.broadcast %cst : f32 to vector<16x128xf32>
    %6 = arith.addf %3, %5 : vector<16x128xf32>
    %cst_4 = arith.constant 0.000000e+00 : f32
    %7 = vector.broadcast %cst_4 : f32 to vector<16x128xf32>
    %8 = arith.cmpf oeq, %4, %7 : vector<16x128xf32>
    %9 = math.log %6 : vector<16x128xf32>
    %10 = arith.mulf %4, %9 : vector<16x128xf32>
    %cst_5 = arith.constant 0.000000e+00 : f32
    %11 = vector.broadcast %cst_5 : f32 to vector<16x128xf32>
    %12 = arith.select %8, %11, %10 : vector<16x128xi1>, vector<16x128xf32>
    %13 = arith.subf %12, %6 : vector<16x128xf32>
    %cst_6 = arith.constant 1.000000e+00 : f32
    %14 = vector.broadcast %cst_6 : f32 to vector<16x128xf32>
    %15 = arith.addf %14, %4 : vector<16x128xf32>
    %16 = tpu.reciprocal %15 {approx = true} : vector<16x128xf32> -> vector<16x128xf32>
    %17 = arith.mulf %15, %16 : vector<16x128xf32>
    %cst_7 = arith.constant 2.000000e+00 : f32
    %18 = vector.broadcast %cst_7 : f32 to vector<16x128xf32>
    %19 = arith.subf %18, %17 : vector<16x128xf32>
    %20 = arith.mulf %16, %19 : vector<16x128xf32>
    %cst_8 = arith.constant 2.000000e+00 : f32
    %21 = vector.broadcast %cst_8 : f32 to vector<16x128xf32>
    %22 = arith.mulf %21, %20 : vector<16x128xf32>
    %cst_9 = arith.constant 1.000000e+00 : f32
    %23 = vector.broadcast %cst_9 : f32 to vector<16x128xf32>
    %24 = arith.subf %22, %23 : vector<16x128xf32>
    %cst_10 = arith.constant 1.1676919E-8 : f32
    %25 = vector.broadcast %cst_10 : f32 to vector<16x128xf32>
    %26 = arith.mulf %25, %24 : vector<16x128xf32>
    %cst_11 = arith.constant -4.99458963E-9 : f32
    %27 = vector.broadcast %cst_11 : f32 to vector<16x128xf32>
    %28 = arith.addf %26, %27 : vector<16x128xf32>
    %29 = arith.mulf %28, %24 : vector<16x128xf32>
    %cst_12 = arith.constant -7.34068308E-8 : f32
    %30 = vector.broadcast %cst_12 : f32 to vector<16x128xf32>
    %31 = arith.addf %29, %30 : vector<16x128xf32>
    %32 = arith.mulf %31, %24 : vector<16x128xf32>
    %cst_13 = arith.constant 1.57495606E-7 : f32
    %33 = vector.broadcast %cst_13 : f32 to vector<16x128xf32>
    %34 = arith.addf %32, %33 : vector<16x128xf32>
    %35 = arith.mulf %34, %24 : vector<16x128xf32>
    %cst_14 = arith.constant -1.08472207E-7 : f32
    %36 = vector.broadcast %cst_14 : f32 to vector<16x128xf32>
    %37 = arith.addf %35, %36 : vector<16x128xf32>
    %38 = arith.mulf %37, %24 : vector<16x128xf32>
    %cst_15 = arith.constant -4.4434708E-7 : f32
    %39 = vector.broadcast %cst_15 : f32 to vector<16x128xf32>
    %40 = arith.addf %38, %39 : vector<16x128xf32>
    %41 = arith.mulf %40, %24 : vector<16x128xf32>
    %cst_16 = arith.constant 2.54447559E-6 : f32
    %42 = vector.broadcast %cst_16 : f32 to vector<16x128xf32>
    %43 = arith.addf %41, %42 : vector<16x128xf32>
    %44 = arith.mulf %43, %24 : vector<16x128xf32>
    %cst_17 = arith.constant -6.39905238E-6 : f32
    %45 = vector.broadcast %cst_17 : f32 to vector<16x128xf32>
    %46 = arith.addf %44, %45 : vector<16x128xf32>
    %47 = arith.mulf %46, %24 : vector<16x128xf32>
    %cst_18 = arith.constant -1.26170494E-6 : f32
    %48 = vector.broadcast %cst_18 : f32 to vector<16x128xf32>
    %49 = arith.addf %47, %48 : vector<16x128xf32>
    %50 = arith.mulf %49, %24 : vector<16x128xf32>
    %cst_19 = arith.constant 1.00767676E-4 : f32
    %51 = vector.broadcast %cst_19 : f32 to vector<16x128xf32>
    %52 = arith.addf %50, %51 : vector<16x128xf32>
    %53 = arith.mulf %52, %24 : vector<16x128xf32>
    %cst_20 = arith.constant -4.85104421E-4 : f32
    %54 = vector.broadcast %cst_20 : f32 to vector<16x128xf32>
    %55 = arith.addf %53, %54 : vector<16x128xf32>
    %56 = arith.mulf %55, %24 : vector<16x128xf32>
    %cst_21 = arith.constant -0.00123001006 : f32
    %57 = vector.broadcast %cst_21 : f32 to vector<16x128xf32>
    %58 = arith.addf %56, %57 : vector<16x128xf32>
    %59 = arith.mulf %58, %24 : vector<16x128xf32>
    %cst_22 = arith.constant 0.0826813951 : f32
    %60 = vector.broadcast %cst_22 : f32 to vector<16x128xf32>
    %61 = arith.addf %59, %60 : vector<16x128xf32>
    %cst_23 = arith.constant 5.000000e-01 : f32
    %62 = vector.broadcast %cst_23 : f32 to vector<16x128xf32>
    %63 = arith.subf %15, %62 : vector<16x128xf32>
    %64 = math.log %15 : vector<16x128xf32>
    %65 = arith.mulf %63, %64 : vector<16x128xf32>
    %66 = arith.subf %65, %15 : vector<16x128xf32>
    %cst_24 = arith.constant 0.918938517 : f32
    %67 = vector.broadcast %cst_24 : f32 to vector<16x128xf32>
    %68 = arith.addf %66, %67 : vector<16x128xf32>
    %69 = arith.mulf %20, %61 : vector<16x128xf32>
    %70 = arith.addf %68, %69 : vector<16x128xf32>
    %71 = arith.subf %13, %70 : vector<16x128xf32>
    %c0_25 = arith.constant 0 : index
    %c0_26 = arith.constant 0 : index
    %72 = vector.load %arg4[%c0_25, %c0_26] : memref<8x128xf32, #tpu.memory_space<vmem>>, vector<8x128xf32>
    %73 = vector.shape_cast %71 : vector<16x128xf32> to vector<2x8x128xf32>
    %cst_27 = arith.constant dense<0.000000e+00> : vector<8x128xf32>
    %74 = vector.multi_reduction <add>, %73, %cst_27 [0] : vector<2x8x128xf32> to vector<8x128xf32>
    %75 = arith.addf %72, %74 : vector<8x128xf32>
    %c0_28 = arith.constant 0 : index
    %c0_29 = arith.constant 0 : index
    %76 = vector.load %arg4[%c0_28, %c0_29] : memref<8x128xf32, #tpu.memory_space<vmem>>, vector<8x128xf32>
    tpu.vector_store %arg4[%c0_28, %c0_29], %75 {strides = array<i32>} : memref<8x128xf32, #tpu.memory_space<vmem>>, vector<8x128xf32>,
    return
  }
  func.func @transform_0(%arg0: i32, %arg1: i32) -> (i32, i32) {
    %c1_i32 = arith.constant 1 : i32
    %0 = arith.muli %arg0, %c1_i32 : i32
    %1 = arith.addi %0, %arg1 : i32
    %c0_i32 = arith.constant 0 : i32
    %c0_i32_0 = arith.constant 0 : i32
    return %1, %c0_i32 : i32, i32
  }
  func.func @transform_1(%arg0: i32, %arg1: i32) -> (i32, i32) {
    %c1_i32 = arith.constant 1 : i32
    %0 = arith.muli %arg0, %c1_i32 : i32
    %1 = arith.addi %0, %arg1 : i32
    %c0_i32 = arith.constant 0 : i32
    %c0_i32_0 = arith.constant 0 : i32
    return %1, %c0_i32 : i32, i32
  }
  func.func @transform_2(%arg0: i32, %arg1: i32) -> (i32, i32) {
    %c0_i32 = arith.constant 0 : i32
    %c0_i32_0 = arith.constant 0 : i32
    return %arg0, %c0_i32 : i32, i32
  }
}

</mosaic_0001>

<bundles_post_ra>
// kernel: tpu_custom_call.1
= control target key start
LH: loop header
LB: loop body
LE: loop exit
PB: predicated region body
PF: predicated region fallthrough
CT: control target
= control target key end

     0   :  { %7 = vsyncpa [#allocation3], 0  ;;  %s360_s0 = inlined_call_operand.hbm [shape: f32[16,128], index: 0, kind: input, shape index: {}]   ;;  %s361_s1 = inlined_call_operand.hbm [shape: f32[16,128], index: 1, kind: input, shape index: {}]   ;;  %s362_s2 = inlined_call_operand.hbm [shape: f32[8,128], index: 2, kind: output, shape index: {}]  }
   0x1   :  { %8 = vsyncpa [#allocation6], 0 }
   0x2   :  { %9 = vsyncpa [#allocation4], 0  ;;  %s263_s9 = smov [#allocation2]  }
   0x3   :  { %s19_s10 = sshll.u32 %s263_s9, 4  ;;  %s20_s10 = int_to_ptr.vmem [resolvable:$true] %s19_s10 }
   0x4   :  { %s205_s11 = scalar_lea.vmem %s20_s10, 256  ;;  %p210_p1 = scmp.lt.s32.totalorder %s20_s10, %s20_s10 }
   0x5   :  { %p206_p0 = scmp.ne.s32.totalorder %s20_s10, %s205_s11  ;;  %p211_p2 = scmp.lt.s32.totalorder %s205_s11, %s205_s11 }
   0x7   :  { %p212_p3 = por %p211_p2, %p210_p1 }
   0x9   :  { %p213_p4 = pnand %p212_p3, %p206_p0 }
   0xb   :  { %216 = shalt.err (!%p213_p4)
}
   0xc   :  { %s264_s12 = smov 128   ;;  %s265_s13 = smov 8  }
   0xd   :  { %25 = dma.hbm_to_vmem [thread:$0]  %s360_s0, 256, %s20_s10, [#allocation3], %s264_s12, %s264_s12, %s265_s13  }
   0xe   :  { %s266_s16 = smov [#allocation5]  }
   0xf   :  { %s35_s17 = sshll.u32 %s266_s16, 4  ;;  %s36_s17 = int_to_ptr.vmem [resolvable:$true] %s35_s17 }
  0x10   :  { %s225_s18 = scalar_lea.vmem %s36_s17, 256  ;;  %p230_p6 = scmp.lt.s32.totalorder %s36_s17, %s36_s17 }
  0x11   :  { %p226_p5 = scmp.ne.s32.totalorder %s36_s17, %s225_s18  ;;  %p231_p7 = scmp.lt.s32.totalorder %s225_s18, %s225_s18 }
  0x13   :  { %p232_p8 = por %p231_p7, %p230_p6 }
  0x15   :  { %p233_p9 = pnand %p232_p8, %p226_p5 }
  0x17   :  { %236 = shalt.err (!%p233_p9)
}
  0x18   :  { %41 = dma.hbm_to_vmem [thread:$0]  %s361_s1, 256, %s36_s17, [#allocation6], %s264_s12, %s264_s12, %s265_s13  }
  0x19   :  { %257 = dma.done.wait [#allocation3], 256  }
  0x1a   :  { %258 = vsyncadd [#allocation3], 4294967040 }
  0x1b   :  { %259 = dma.done.wait [#allocation6], 256  }
  0x1c   :  { %260 = vsyncadd [#allocation6], 4294967040  ;;  %v289_v0 = vld [vmem:[#allocation5] sm:$0xff]  ;;  %v291_v1 = vld [vmem:[#allocation5 + $0x8] sm:$0xff]  ;;  %s267_s0 = smov [#allocation7]  }
  0x1d   :  { %v294_v2 = vadd.f32 1.0, %v289_v0  ;;  %v297_v3 = vadd.f32 1.0, %v291_v1  ;;  %v57_v30 = vld [vmem:[#allocation2] sm:$0xff]  ;;  %v58_v32 = vld [vmem:[#allocation2 + $0x8] sm:$0xff]  ;;  %vm63_vm0 = vcmp.eq.f32.partialorder %v289_v0, 0.0  ;;  %vm64_vm1 = vcmp.eq.f32.partialorder %v291_v1, 0.0 }
  0x1e   :  { %v322_v35 = vadd.f32 1e-08, %v57_v30  ;;  %v325_v37 = vadd.f32 1e-08, %v58_v32  ;;  %s165_s1 = sshll.u32 %s267_s0, 4  ;;  %s166_s1 = int_to_ptr.vmem [resolvable:$true] %s165_s1 }
  0x1f   :  { %185 = vrcp.f32 %v294_v2  ;;  %v177_v58 = vadd.f32 -0.5, %v294_v2  ;;  %v178_v62 = vadd.f32 -0.5, %v297_v3  ;;  %s237_s21 = scalar_lea.vmem %s166_s1, 128  ;;  %p242_p11 = scmp.lt.s32.totalorder %s166_s1, %s166_s1 }
  0x20   :  { %187 = vrcp.f32 %v297_v3  ;;  %p238_p10 = scmp.ne.s32.totalorder %s166_s1, %s237_s21  ;;  %p243_p12 = scmp.lt.s32.totalorder %s237_s21, %s237_s21 }
  0x21   :  { %189 = vlog2.f32 %v294_v2 }
  0x22   :  { %191 = vlog2.f32 %v297_v3  ;;  %p244_p13 = por %p243_p12, %p242_p11 }
  0x23   :  { %193 = vlog2.f32 %v322_v35 }
  0x24   :  { %195 = vlog2.f32 %v325_v37  ;;  %p245_p0 = pnand %p244_p13, %p238_p10 }
  0x2c   :  { %v186_v4 = vpop.eup %185 }
  0x2d   :  { %v188_v5 = vpop.eup %187  ;;  %v79_v6 = vmul.f32 %v186_v4, %v294_v2 }
  0x2e   :  { %v80_v7 = vmul.f32 %v188_v5, %v297_v3  ;;  %v190_v51 = vpop.eup %189 }
  0x2f   :  { %v81_v8 = vsub.f32 2.0, %v79_v6  ;;  %v192_v53 = vpop.eup %191  ;;  %v140_v59 = vmul.f32 0.6931472, %v190_v51 }
  0x30   :  { %v82_v9 = vsub.f32 2.0, %v80_v7  ;;  %v194_v56 = vpop.eup %193  ;;  %v142_v63 = vmul.f32 0.6931472, %v192_v53 }
  0x31   :  { %v303_v10 = vmul.f32 %v186_v4, %v81_v8  ;;  %v196_v60 = vpop.eup %195 }
  0x32   :  { %v305_v11 = vmul.f32 %v188_v5, %v82_v9  ;;  %v66_v5 = vmul.f32 0.6931472, %v194_v56  ;;  %v68_v7 = vmul.f32 0.6931472, %v196_v60  ;;  %v143_v9 = vmul.f32 %v177_v58, %v140_v59 }
  0x33   :  { %v85_v12 = vmul.f32 2.0, %v303_v10 }
  0x34   :  { %v86_v13 = vmul.f32 2.0, %v305_v11 }
  0x35   :  { %v309_v14 = vadd.f32 -1.0, %v85_v12 }
  0x36   :  { %v311_v15 = vadd.f32 -1.0, %v86_v13  ;;  %v144_v13 = vmul.f32 %v178_v62, %v142_v63 }
  0x37   :  { %v89_v16 = vmul.f32 1.1676919e-08, %v309_v14 }
  0x38   :  { %v90_v17 = vmul.f32 1.1676919e-08, %v311_v15 }
  0x39   :  { %v91_v18 = vadd.f32 -4.9945896e-09, %v89_v16 }
  0x3a   :  { %v92_v19 = vadd.f32 -4.9945896e-09, %v90_v17  ;;  %v69_v17 = vmul.f32 %v66_v5, %v289_v0 }
  0x3b   :  { %v93_v20 = vmul.f32 %v309_v14, %v91_v18 }
  0x3c   :  { %v94_v21 = vmul.f32 %v311_v15, %v92_v19  ;;  %v70_v19 = vmul.f32 %v68_v7, %v291_v1 }
  0x3d   :  { %v95_v22 = vadd.f32 -7.340683e-08, %v93_v20 }
  0x3e   :  { %v96_v23 = vadd.f32 -7.340683e-08, %v94_v21  ;;  %v145_v21 = vsub.f32 %v143_v9, %v294_v2 }
  0x3f   :  { %v97_v24 = vmul.f32 %v309_v14, %v95_v22 }
  0x40   :  { %v98_v25 = vmul.f32 %v311_v15, %v96_v23  ;;  %v146_v23 = vsub.f32 %v144_v13, %v297_v3 }
  0x41   :  { %v99_v26 = vadd.f32 1.574956e-07, %v97_v24 }
  0x42   :  { %v100_v27 = vadd.f32 1.574956e-07, %v98_v25  ;;  %v71_v25 = vsel %vm63_vm0, 0.0, %v69_v17  ;;  %v148_v0 = vadd.f32 0.9189385, %v146_v23 }
  0x43   :  { %v101_v28 = vmul.f32 %v309_v14, %v99_v26 }
  0x44   :  { %v102_v29 = vmul.f32 %v311_v15, %v100_v27  ;;  %v72_v27 = vsel %vm64_vm1, 0.0, %v70_v19 }
  0x45   :  { %v103_v31 = vadd.f32 -1.0847221e-07, %v101_v28  ;;  %v74_v2 = vsub.f32 %v72_v27, %v325_v37 }
  0x46   :  { %v104_v33 = vadd.f32 -1.0847221e-07, %v102_v29  ;;  %v147_v29 = vadd.f32 0.9189385, %v145_v21 }
  0x47   :  { %v105_v34 = vmul.f32 %v309_v14, %v103_v31  ;;  %v73_v31 = vsub.f32 %v71_v25, %v322_v35 }
  0x48   :  { %v106_v36 = vmul.f32 %v311_v15, %v104_v33 }
  0x49   :  { %v107_v38 = vadd.f32 -4.4434708e-07, %v105_v34 }
  0x4a   :  { %v108_v39 = vadd.f32 -4.4434708e-07, %v106_v36 }
  0x4b   :  { %v109_v40 = vmul.f32 %v309_v14, %v107_v38 }
  0x4c   :  { %v110_v41 = vmul.f32 %v311_v15, %v108_v39 }
  0x4d   :  { %v111_v42 = vadd.f32 2.5444756e-06, %v109_v40 }
  0x4e   :  { %v112_v43 = vadd.f32 2.5444756e-06, %v110_v41 }
  0x4f   :  { %v113_v44 = vmul.f32 %v309_v14, %v111_v42 }
  0x50   :  { %v114_v45 = vmul.f32 %v311_v15, %v112_v43 }
  0x51   :  { %v115_v46 = vadd.f32 -6.3990524e-06, %v113_v44 }
  0x52   :  { %v116_v47 = vadd.f32 -6.3990524e-06, %v114_v45 }
  0x53   :  { %v117_v48 = vmul.f32 %v309_v14, %v115_v46 }
  0x54   :  { %v118_v49 = vmul.f32 %v311_v15, %v116_v47 }
  0x55   :  { %v119_v50 = vadd.f32 -1.2617049e-06, %v117_v48 }
  0x56   :  { %v120_v52 = vadd.f32 -1.2617049e-06, %v118_v49 }
  0x57   :  { %v121_v54 = vmul.f32 %v309_v14, %v119_v50 }
  0x58   :  { %v122_v55 = vmul.f32 %v311_v15, %v120_v52 }
  0x59   :  { %v123_v57 = vadd.f32 0.00010076768, %v121_v54 }
  0x5a   :  { %v124_v61 = vadd.f32 0.00010076768, %v122_v55 }
  0x5b   :  { %v125_v4 = vmul.f32 %v309_v14, %v123_v57 }
  0x5c   :  { %v126_v6 = vmul.f32 %v311_v15, %v124_v61 }
  0x5d   :  { %v127_v8 = vadd.f32 -0.00048510442, %v125_v4 }
  0x5e   :  { %v128_v12 = vadd.f32 -0.00048510442, %v126_v6 }
  0x5f   :  { %v129_v16 = vmul.f32 %v309_v14, %v127_v8 }
  0x60   :  { %v130_v18 = vmul.f32 %v311_v15, %v128_v12 }
  0x61   :  { %v131_v20 = vadd.f32 -0.0012300101, %v129_v16 }
  0x62   :  { %v132_v22 = vadd.f32 -0.0012300101, %v130_v18 }
  0x63   :  { %v133_v24 = vmul.f32 %v309_v14, %v131_v20 }
  0x64   :  { %v134_v26 = vmul.f32 %v311_v15, %v132_v22 }
  0x65   :  { %v135_v28 = vadd.f32 0.082681395, %v133_v24 }
  0x66   :  { %v136_v30 = vadd.f32 0.082681395, %v134_v26 }
  0x67   :  { %v149_v32 = vmul.f32 %v135_v28, %v303_v10 }
  0x68   :  { %v150_v1 = vmul.f32 %v136_v30, %v305_v11 }
  0x69   :  { %v151_v33 = vadd.f32 %v149_v32, %v147_v29 }
  0x6a   :  { %v152_v3 = vadd.f32 %v150_v1, %v148_v0 }
  0x6b   :  { %v153_v34 = vsub.f32 %v73_v31, %v151_v33 }
  0x6c   :  { %v154_v14 = vsub.f32 %v74_v2, %v152_v3 }
  0x6e   :  { %v156_v15 = vadd.f32 %v154_v14, %v153_v34 }
  0x70   :  { %158 = vst [vmem:[#allocation7] sm:$0xff] %v156_v15 }
  0x71   :  { %248 = shalt.err (!%p245_p0)
}
  0x72   :  { %168 = dma.vmem_to_hbm [thread:$0]  %s166_s1, 128, %s362_s2, [#allocation4]  }
  0x73   :  { %261 = dma.done.wait [#allocation4], 128  }
  0x74   :  { %262 = vsyncadd [#allocation4], 4294967168 }
  0x75   :  { %172 = vsyncpa [#allocation3], 1 }
  0x76   :  { %173 = vsyncpa [#allocation6], 1 }
  0x77   :  { %174 = vsyncpa [#allocation4], 1 }

</bundles_post_ra>
